<compile_context>
chip_gen: v6e
topology: v6e:2x2x1
jax: 0.10.0
libtpu: 0.0.40
codegen_flags: <defaults>
</compile_context>

<pallas_src>
import functools
import math

import jax
import jax.numpy as jnp
from jax import lax
from jax.experimental import pallas as pl
from jax.experimental.pallas import tpu as pltpu


# ---------------------------------------------------------------------------
# Fused MHA kernel: one grid step = Bt batch elements.
# ---------------------------------------------------------------------------

def _mha_kernel(xq_ref, xk_ref, xv_ref,
                w1_ref, b1_ref, w2_ref, b2_ref, w3_ref, b3_ref,
                w4_ref, b4_ref,
                o_ref,
                ctx_ref,                      # VMEM scratch (Bt*S, E) f32
                *, n_heads, dim_k, bt, seq):
    embed = n_heads * dim_k
    rows = bt * seq
    scale = 1.0 / math.sqrt(dim_k)            # compile-time constant

    # Merge (Bt, S, E) -> (Bt*S, E): leading-dim collapse, layout-preserving.
    xq = xq_ref[...].reshape(rows, embed)
    xk = xk_ref[...].reshape(rows, embed)
    xv = xv_ref[...].reshape(rows, embed)

    # Q/K/V projections: bf16 MXU operands, f32 accumulation.
    def proj(x, w_ref, b_ref):
        return jnp.dot(x.astype(jnp.bfloat16),
                       w_ref[...].astype(jnp.bfloat16),
                       preferred_element_type=jnp.float32) + b_ref[...]

    q = proj(xq, w1_ref, b1_ref) * scale       # fold 1/sqrt(dk) into q (S*E mults)
    k = proj(xk, w2_ref, b2_ref)
    v = proj(xv, w3_ref, b3_ref)

    # Per-head attention; n_heads is static -> the loop unrolls at trace time.
    # Only one head's (Bt,S,dk) context is live at a time (scratch writes).
    for h in range(n_heads):
        lo = h * dim_k
        qh = q[:, lo:lo + dim_k].reshape(bt, seq, dim_k).astype(jnp.bfloat16)
        kh = k[:, lo:lo + dim_k].reshape(bt, seq, dim_k).astype(jnp.bfloat16)
        vh = v[:, lo:lo + dim_k].reshape(bt, seq, dim_k).astype(jnp.bfloat16)

        # Batched QK^T over the Bt batch rows, contracting dk (no k transpose).
        s = lax.dot_general(qh, kh,
                            dimension_numbers=(((2,), (2,)), ((0,), (0,))),
                            preferred_element_type=jnp.float32)      # (Bt,S,S)

        # Softmax statistics in f32 (v5e-safe); keep p UNnormalized here.
        m = jnp.max(s, axis=-1, keepdims=True)
        p = jnp.exp(s - m)
        denom = jnp.sum(p, axis=-1, keepdims=True)                    # (Bt,S,1)

        # PV matmul on unnormalized p, then normalize the (Bt,S,dk) result:
        # S*dk multiplies instead of S*S.
        ctx_h = lax.dot_general(p.astype(jnp.bfloat16), vh,
                                dimension_numbers=(((2,), (1,)), ((0,), (0,))),
                                preferred_element_type=jnp.float32)   # (Bt,S,dk)
        ctx_h = ctx_h * pl.reciprocal(denom, approx=True)             # EUP slot

        # Static lane-slice store into the merged-head scratch accumulator.
        ctx_ref[:, lo:lo + dim_k] = ctx_h.reshape(rows, dim_k)

    # Output projection on the lane-dense (Bt*S, E) context slab.
    out = jnp.dot(ctx_ref[...].astype(jnp.bfloat16),
                  w4_ref[...].astype(jnp.bfloat16),
                  preferred_element_type=jnp.float32) + b4_ref[...]
    o_ref[...] = out.reshape(bt, seq, embed).astype(o_ref.dtype)


@functools.partial(jax.jit, static_argnames=("n_heads",))
def multi_headed_attention(params, query, key, value, n_heads):
    """query/key/value: (B, S, E) -> (B, S, E). Single fused pallas_call."""
    B, S, E = query.shape
    assert E % n_heads == 0
    dim_k = E // n_heads
    itemsize = jnp.dtype(query.dtype).itemsize

    w1, b1 = params["linear_1"]
    w2, b2 = params["linear_2"]
    w3, b3 = params["linear_3"]
    w4, b4 = params["linear_4"]
    b1 = b1.reshape(1, E)
    b2 = b2.reshape(1, E)
    b3 = b3.reshape(1, E)
    b4 = b4.reshape(1, E)

    # Batch elements per grid step: largest divisor of B whose (Bt,S,E)
    # activation block stays under a ~1 MiB per-operand budget. Amortizes the
    # per-step fixed cost (dominant at small shapes). NOTE: on v7x with a
    # resulting grid of 1 and large S, add a second "parallel" axis over
    # query-row tiles so both TensorCores get work.
    bt_cap = max(1, min(B, (1 << 20) // (S * E * itemsize)))
    bt = max(d for d in range(1, bt_cap + 1) if B % d == 0)
    grid_b = B // bt

    kernel = functools.partial(_mha_kernel, n_heads=n_heads, dim_k=dim_k,
                               bt=bt, seq=S)

    act_spec = pl.BlockSpec((bt, S, E), lambda b: (b, 0, 0))
    w_spec = pl.BlockSpec((E, E), lambda b: (0, 0))
    bias_spec = pl.BlockSpec((1, E), lambda b: (0, 0))

    cost = pl.CostEstimate(
        flops=8 * B * S * E * E + 4 * B * n_heads * S * S * dim_k,
        transcendentals=B * n_heads * S * S + B * n_heads * S,
        bytes_accessed=4 * B * S * E * itemsize + 4 * (E * E + E) * 4,
    )

    return pl.pallas_call(
        kernel,
        out_shape=jax.ShapeDtypeStruct((B, S, E), query.dtype),
        grid_spec=pltpu.PrefetchScalarGridSpec(
            num_scalar_prefetch=0,
            grid=(grid_b,),
            in_specs=[act_spec, act_spec, act_spec,
                      w_spec, bias_spec,      # linear_1
                      w_spec, bias_spec,      # linear_2
                      w_spec, bias_spec,      # linear_3
                      w_spec, bias_spec],     # linear_4
            out_specs=pl.BlockSpec((bt, S, E), lambda b: (b, 0, 0)),
            scratch_shapes=[pltpu.VMEM((bt * S, E), jnp.float32)],
        ),
        compiler_params=pltpu.CompilerParams(
            dimension_semantics=("parallel",)),
        cost_estimate=cost,
    )(query, key, value, w1, b1, w2, b2, w3, b3, w4, b4)


# ---------------------------------------------------------------------------
# Params + pure-JAX reference (mirrors the PyTorch forward, dropout=0, mask=None)
# ---------------------------------------------------------------------------

def init_params(key, embed_size):
    """Weights stored as (in, out) so y = x @ W + b."""
    keys = jax.random.split(key, 8)

    def lin(kw, kb):
        w = jax.random.normal(kw, (embed_size, embed_size), jnp.float32) * 0.05
        b = jax.random.normal(kb, (embed_size,), jnp.float32) * 0.05
        return w, b

    return {
        "linear_1": lin(keys[0], keys[1]),
        "linear_2": lin(keys[2], keys[3]),
        "linear_3": lin(keys[4], keys[5]),
        "linear_4": lin(keys[6], keys[7]),
    }


def reference(params, query, key, value, n_heads):
    B, S, E = query.shape
    dim_k = E // n_heads

    def lin(p, x):
        w, b = p
        return x @ w + b

    def split(x):
        return x.reshape(B, S, n_heads, dim_k).transpose(0, 2, 1, 3)

    q = split(lin(params["linear_1"], query))
    k = split(lin(params["linear_2"], key))
    v = split(lin(params["linear_3"], value))
    scores = jnp.einsum("bhqd,bhkd->bhqk", q, k) / math.sqrt(dim_k)
    p = jax.nn.softmax(scores, axis=-1)
    out = jnp.einsum("bhqk,bhkd->bhqd", p, v)
    out = out.transpose(0, 2, 1, 3).reshape(B, S, E)
    return lin(params["linear_4"], out)


if __name__ == "__main__":
    B, S, E, H = 2, 8, 32, 4          # batch, seq_len, embed_size, nHeads
    root = jax.random.PRNGKey(0)
    k_params, k_q, k_k, k_v = jax.random.split(root, 4)

    params = init_params(k_params, E)
    query = jax.random.normal(k_q, (B, S, E), jnp.float32)
    key_in = jax.random.normal(k_k, (B, S, E), jnp.float32)
    value = jax.random.normal(k_v, (B, S, E), jnp.float32)

    out = multi_headed_attention(params, query, key_in, value, H)
    out = jax.block_until_ready(out)

    ref = reference(params, query, key_in, value, H)
    assert out.shape == (B, S, E)
    # Tolerance covers bf16 MXU operands + approx (EUP) reciprocal in softmax.
    assert jnp.allclose(out, ref, atol=2e-2, rtol=2e-2), "mismatch vs reference"

    print("KERNEL_OK")
</pallas_src>

<mosaic_0001>
module attributes {stable_mosaic.version = 11 : i64} {
  func.func @_mha_kernel(%arg0: i32, %arg1: memref<2x8x32xf32, #tpu.memory_space<vmem>>, %arg2: memref<2x8x32xf32, #tpu.memory_space<vmem>>, %arg3: memref<2x8x32xf32, #tpu.memory_space<vmem>>, %arg4: memref<32x32xf32, #tpu.memory_space<vmem>>, %arg5: memref<1x32xf32, #tpu.memory_space<vmem>>, %arg6: memref<32x32xf32, #tpu.memory_space<vmem>>, %arg7: memref<1x32xf32, #tpu.memory_space<vmem>>, %arg8: memref<32x32xf32, #tpu.memory_space<vmem>>, %arg9: memref<1x32xf32, #tpu.memory_space<vmem>>, %arg10: memref<32x32xf32, #tpu.memory_space<vmem>>, %arg11: memref<1x32xf32, #tpu.memory_space<vmem>>, %arg12: memref<2x8x32xf32, #tpu.memory_space<vmem>>, %arg13: memref<16x32xf32, #tpu.memory_space<vmem>>) attributes {dimension_semantics = [#tpu.dimension_semantics<parallel>], iteration_bounds = array<i64: 1>, scalar_prefetch = 0 : i64, scratch_operands = 1 : i64, tpu.core_type = #tpu.core_type<tc>, window_params = [{transform_indices = @transform_0, window_bounds = array<i64: 2, 8, 32>}, {transform_indices = @transform_1, window_bounds = array<i64: 2, 8, 32>}, {transform_indices = @transform_2, window_bounds = array<i64: 2, 8, 32>}, {pipeline_mode = #tpu.pipeline_mode<synchronous>, transform_indices = @transform_3, window_bounds = array<i64: 32, 32>}, {pipeline_mode = #tpu.pipeline_mode<synchronous>, transform_indices = @transform_4, window_bounds = array<i64: 1, 32>}, {pipeline_mode = #tpu.pipeline_mode<synchronous>, transform_indices = @transform_5, window_bounds = array<i64: 32, 32>}, {pipeline_mode = #tpu.pipeline_mode<synchronous>, transform_indices = @transform_6, window_bounds = array<i64: 1, 32>}, {pipeline_mode = #tpu.pipeline_mode<synchronous>, transform_indices = @transform_7, window_bounds = array<i64: 32, 32>}, {pipeline_mode = #tpu.pipeline_mode<synchronous>, transform_indices = @transform_8, window_bounds = array<i64: 1, 32>}, {pipeline_mode = #tpu.pipeline_mode<synchronous>, transform_indices = @transform_9, window_bounds = array<i64: 32, 32>}, {pipeline_mode = #tpu.pipeline_mode<synchronous>, transform_indices = @transform_10, window_bounds = array<i64: 1, 32>}, {transform_indices = @transform_11, window_bounds = array<i64: 2, 8, 32>}]} {
    %c0 = arith.constant 0 : index
    %c0_0 = arith.constant 0 : index
    %c0_1 = arith.constant 0 : index
    %0 = vector.load %arg1[%c0, %c0_0, %c0_1] : memref<2x8x32xf32, #tpu.memory_space<vmem>>, vector<2x8x32xf32>
    %1 = vector.shape_cast %0 : vector<2x8x32xf32> to vector<16x32xf32>
    %c0_2 = arith.constant 0 : index
    %c0_3 = arith.constant 0 : index
    %c0_4 = arith.constant 0 : index
    %2 = vector.load %arg2[%c0_2, %c0_3, %c0_4] : memref<2x8x32xf32, #tpu.memory_space<vmem>>, vector<2x8x32xf32>
    %3 = vector.shape_cast %2 : vector<2x8x32xf32> to vector<16x32xf32>
    %c0_5 = arith.constant 0 : index
    %c0_6 = arith.constant 0 : index
    %c0_7 = arith.constant 0 : index
    %4 = vector.load %arg3[%c0_5, %c0_6, %c0_7] : memref<2x8x32xf32, #tpu.memory_space<vmem>>, vector<2x8x32xf32>
    %5 = vector.shape_cast %4 : vector<2x8x32xf32> to vector<16x32xf32>
    %6 = arith.truncf %1 : vector<16x32xf32> to vector<16x32xbf16>
    %c0_8 = arith.constant 0 : index
    %c0_9 = arith.constant 0 : index
    %7 = vector.load %arg4[%c0_8, %c0_9] : memref<32x32xf32, #tpu.memory_space<vmem>>, vector<32x32xf32>
    %8 = arith.truncf %7 : vector<32x32xf32> to vector<32x32xbf16>
    %cst = arith.constant dense<0.000000e+00> : vector<16x32xf32>
    %9 = tpu.matmul %6, %8, %cst {dimension_numbers = #tpu.dot_dimension_numbers<[1], [0], [0], [1], [0, 0, 1, 1], [], []>} : vector<16x32xbf16>, vector<32x32xbf16>, vector<16x32xf32> -> vector<16x32xf32>
    %c0_10 = arith.constant 0 : index
    %c0_11 = arith.constant 0 : index
    %10 = vector.load %arg5[%c0_10, %c0_11] : memref<1x32xf32, #tpu.memory_space<vmem>>, vector<1x32xf32>
    %11 = vector.broadcast %10 : vector<1x32xf32> to vector<16x32xf32>
    %12 = arith.addf %9, %11 : vector<16x32xf32>
    %cst_12 = arith.constant 0.353553385 : f32
    %13 = vector.broadcast %cst_12 : f32 to vector<16x32xf32>
    %14 = arith.mulf %12, %13 : vector<16x32xf32>
    %15 = arith.truncf %3 : vector<16x32xf32> to vector<16x32xbf16>
    %c0_13 = arith.constant 0 : index
    %c0_14 = arith.constant 0 : index
    %16 = vector.load %arg6[%c0_13, %c0_14] : memref<32x32xf32, #tpu.memory_space<vmem>>, vector<32x32xf32>
    %17 = arith.truncf %16 : vector<32x32xf32> to vector<32x32xbf16>
    %cst_15 = arith.constant dense<0.000000e+00> : vector<16x32xf32>
    %18 = tpu.matmul %15, %17, %cst_15 {dimension_numbers = #tpu.dot_dimension_numbers<[1], [0], [0], [1], [0, 0, 1, 1], [], []>} : vector<16x32xbf16>, vector<32x32xbf16>, vector<16x32xf32> -> vector<16x32xf32>
    %c0_16 = arith.constant 0 : index
    %c0_17 = arith.constant 0 : index
    %19 = vector.load %arg7[%c0_16, %c0_17] : memref<1x32xf32, #tpu.memory_space<vmem>>, vector<1x32xf32>
    %20 = vector.broadcast %19 : vector<1x32xf32> to vector<16x32xf32>
    %21 = arith.addf %18, %20 : vector<16x32xf32>
    %22 = arith.truncf %5 : vector<16x32xf32> to vector<16x32xbf16>
    %c0_18 = arith.constant 0 : index
    %c0_19 = arith.constant 0 : index
    %23 = vector.load %arg8[%c0_18, %c0_19] : memref<32x32xf32, #tpu.memory_space<vmem>>, vector<32x32xf32>
    %24 = arith.truncf %23 : vector<32x32xf32> to vector<32x32xbf16>
    %cst_20 = arith.constant dense<0.000000e+00> : vector<16x32xf32>
    %25 = tpu.matmul %22, %24, %cst_20 {dimension_numbers = #tpu.dot_dimension_numbers<[1], [0], [0], [1], [0, 0, 1, 1], [], []>} : vector<16x32xbf16>, vector<32x32xbf16>, vector<16x32xf32> -> vector<16x32xf32>
    %c0_21 = arith.constant 0 : index
    %c0_22 = arith.constant 0 : index
    %26 = vector.load %arg9[%c0_21, %c0_22] : memref<1x32xf32, #tpu.memory_space<vmem>>, vector<1x32xf32>
    %27 = vector.broadcast %26 : vector<1x32xf32> to vector<16x32xf32>
    %28 = arith.addf %25, %27 : vector<16x32xf32>
    %29 = vector.extract_strided_slice %14 {offsets = [0, 0], sizes = [16, 8], strides = [1, 1]} : vector<16x32xf32> to vector<16x8xf32>
    %30 = vector.shape_cast %29 : vector<16x8xf32> to vector<2x8x8xf32>
    %31 = arith.truncf %30 : vector<2x8x8xf32> to vector<2x8x8xbf16>
    %32 = vector.extract_strided_slice %21 {offsets = [0, 0], sizes = [16, 8], strides = [1, 1]} : vector<16x32xf32> to vector<16x8xf32>
    %33 = vector.shape_cast %32 : vector<16x8xf32> to vector<2x8x8xf32>
    %34 = arith.truncf %33 : vector<2x8x8xf32> to vector<2x8x8xbf16>
    %35 = vector.extract_strided_slice %28 {offsets = [0, 0], sizes = [16, 8], strides = [1, 1]} : vector<16x32xf32> to vector<16x8xf32>
    %36 = vector.shape_cast %35 : vector<16x8xf32> to vector<2x8x8xf32>
    %37 = arith.truncf %36 : vector<2x8x8xf32> to vector<2x8x8xbf16>
    %cst_23 = arith.constant dense<0.000000e+00> : vector<2x8x8xf32>
    %38 = tpu.matmul %31, %34, %cst_23 {dimension_numbers = #tpu.dot_dimension_numbers<[2], [2], [1], [1], [0, 0, 0, 1, 1, 1], [0], [0]>} : vector<2x8x8xbf16>, vector<2x8x8xbf16>, vector<2x8x8xf32> -> vector<2x8x8xf32>
    %cst_24 = arith.constant dense<0xFF800000> : vector<2x8xf32>
    %39 = vector.multi_reduction <maximumf>, %38, %cst_24 [2] : vector<2x8x8xf32> to vector<2x8xf32>
    %40 = vector.shape_cast %39 : vector<2x8xf32> to vector<2x8x1xf32>
    %41 = vector.broadcast %40 : vector<2x8x1xf32> to vector<2x8x8xf32>
    %42 = arith.subf %38, %41 : vector<2x8x8xf32>
    %43 = math.exp %42 : vector<2x8x8xf32>
    %cst_25 = arith.constant dense<0.000000e+00> : vector<2x8xf32>
    %44 = vector.multi_reduction <add>, %43, %cst_25 [2] : vector<2x8x8xf32> to vector<2x8xf32>
    %45 = vector.shape_cast %44 : vector<2x8xf32> to vector<2x8x1xf32>
    %46 = arith.truncf %43 : vector<2x8x8xf32> to vector<2x8x8xbf16>
    %cst_26 = arith.constant dense<0.000000e+00> : vector<2x8x8xf32>
    %47 = tpu.matmul %46, %37, %cst_26 {dimension_numbers = #tpu.dot_dimension_numbers<[2], [1], [1], [2], [0, 0, 0, 1, 1, 2], [0], [0]>} : vector<2x8x8xbf16>, vector<2x8x8xbf16>, vector<2x8x8xf32> -> vector<2x8x8xf32>
    %48 = tpu.reciprocal %45 {approx = true} : vector<2x8x1xf32> -> vector<2x8x1xf32>
    %49 = vector.broadcast %48 : vector<2x8x1xf32> to vector<2x8x8xf32>
    %50 = arith.mulf %47, %49 : vector<2x8x8xf32>
    %51 = vector.shape_cast %50 : vector<2x8x8xf32> to vector<16x8xf32>
    %c0_27 = arith.constant 0 : index
    %c0_28 = arith.constant 0 : index
    %52 = vector.load %arg13[%c0_27, %c0_28] : memref<16x32xf32, #tpu.memory_space<vmem>>, vector<16x8xf32>
    tpu.vector_store %arg13[%c0_27, %c0_28], %51 {strides = array<i32>} : memref<16x32xf32, #tpu.memory_space<vmem>>, vector<16x8xf32>,
    %53 = vector.extract_strided_slice %14 {offsets = [0, 8], sizes = [16, 8], strides = [1, 1]} : vector<16x32xf32> to vector<16x8xf32>
    %54 = vector.shape_cast %53 : vector<16x8xf32> to vector<2x8x8xf32>
    %55 = arith.truncf %54 : vector<2x8x8xf32> to vector<2x8x8xbf16>
    %56 = vector.extract_strided_slice %21 {offsets = [0, 8], sizes = [16, 8], strides = [1, 1]} : vector<16x32xf32> to vector<16x8xf32>
    %57 = vector.shape_cast %56 : vector<16x8xf32> to vector<2x8x8xf32>
    %58 = arith.truncf %57 : vector<2x8x8xf32> to vector<2x8x8xbf16>
    %59 = vector.extract_strided_slice %28 {offsets = [0, 8], sizes = [16, 8], strides = [1, 1]} : vector<16x32xf32> to vector<16x8xf32>
    %60 = vector.shape_cast %59 : vector<16x8xf32> to vector<2x8x8xf32>
    %61 = arith.truncf %60 : vector<2x8x8xf32> to vector<2x8x8xbf16>
    %cst_29 = arith.constant dense<0.000000e+00> : vector<2x8x8xf32>
    %62 = tpu.matmul %55, %58, %cst_29 {dimension_numbers = #tpu.dot_dimension_numbers<[2], [2], [1], [1], [0, 0, 0, 1, 1, 1], [0], [0]>} : vector<2x8x8xbf16>, vector<2x8x8xbf16>, vector<2x8x8xf32> -> vector<2x8x8xf32>
    %cst_30 = arith.constant dense<0xFF800000> : vector<2x8xf32>
    %63 = vector.multi_reduction <maximumf>, %62, %cst_30 [2] : vector<2x8x8xf32> to vector<2x8xf32>
    %64 = vector.shape_cast %63 : vector<2x8xf32> to vector<2x8x1xf32>
    %65 = vector.broadcast %64 : vector<2x8x1xf32> to vector<2x8x8xf32>
    %66 = arith.subf %62, %65 : vector<2x8x8xf32>
    %67 = math.exp %66 : vector<2x8x8xf32>
    %cst_31 = arith.constant dense<0.000000e+00> : vector<2x8xf32>
    %68 = vector.multi_reduction <add>, %67, %cst_31 [2] : vector<2x8x8xf32> to vector<2x8xf32>
    %69 = vector.shape_cast %68 : vector<2x8xf32> to vector<2x8x1xf32>
    %70 = arith.truncf %67 : vector<2x8x8xf32> to vector<2x8x8xbf16>
    %cst_32 = arith.constant dense<0.000000e+00> : vector<2x8x8xf32>
    %71 = tpu.matmul %70, %61, %cst_32 {dimension_numbers = #tpu.dot_dimension_numbers<[2], [1], [1], [2], [0, 0, 0, 1, 1, 2], [0], [0]>} : vector<2x8x8xbf16>, vector<2x8x8xbf16>, vector<2x8x8xf32> -> vector<2x8x8xf32>
    %72 = tpu.reciprocal %69 {approx = true} : vector<2x8x1xf32> -> vector<2x8x1xf32>
    %73 = vector.broadcast %72 : vector<2x8x1xf32> to vector<2x8x8xf32>
    %74 = arith.mulf %71, %73 : vector<2x8x8xf32>
    %75 = vector.shape_cast %74 : vector<2x8x8xf32> to vector<16x8xf32>
    %c0_33 = arith.constant 0 : index
    %c8 = arith.constant 8 : index
    %76 = vector.load %arg13[%c0_33, %c8] : memref<16x32xf32, #tpu.memory_space<vmem>>, vector<16x8xf32>
    tpu.vector_store %arg13[%c0_33, %c8], %75 {strides = array<i32>} : memref<16x32xf32, #tpu.memory_space<vmem>>, vector<16x8xf32>,
    %77 = vector.extract_strided_slice %14 {offsets = [0, 16], sizes = [16, 8], strides = [1, 1]} : vector<16x32xf32> to vector<16x8xf32>
    %78 = vector.shape_cast %77 : vector<16x8xf32> to vector<2x8x8xf32>
    %79 = arith.truncf %78 : vector<2x8x8xf32> to vector<2x8x8xbf16>
    %80 = vector.extract_strided_slice %21 {offsets = [0, 16], sizes = [16, 8], strides = [1, 1]} : vector<16x32xf32> to vector<16x8xf32>
    %81 = vector.shape_cast %80 : vector<16x8xf32> to vector<2x8x8xf32>
    %82 = arith.truncf %81 : vector<2x8x8xf32> to vector<2x8x8xbf16>
    %83 = vector.extract_strided_slice %28 {offsets = [0, 16], sizes = [16, 8], strides = [1, 1]} : vector<16x32xf32> to vector<16x8xf32>
    %84 = vector.shape_cast %83 : vector<16x8xf32> to vector<2x8x8xf32>
    %85 = arith.truncf %84 : vector<2x8x8xf32> to vector<2x8x8xbf16>
    %cst_34 = arith.constant dense<0.000000e+00> : vector<2x8x8xf32>
    %86 = tpu.matmul %79, %82, %cst_34 {dimension_numbers = #tpu.dot_dimension_numbers<[2], [2], [1], [1], [0, 0, 0, 1, 1, 1], [0], [0]>} : vector<2x8x8xbf16>, vector<2x8x8xbf16>, vector<2x8x8xf32> -> vector<2x8x8xf32>
    %cst_35 = arith.constant dense<0xFF800000> : vector<2x8xf32>
    %87 = vector.multi_reduction <maximumf>, %86, %cst_35 [2] : vector<2x8x8xf32> to vector<2x8xf32>
    %88 = vector.shape_cast %87 : vector<2x8xf32> to vector<2x8x1xf32>
    %89 = vector.broadcast %88 : vector<2x8x1xf32> to vector<2x8x8xf32>
    %90 = arith.subf %86, %89 : vector<2x8x8xf32>
    %91 = math.exp %90 : vector<2x8x8xf32>
    %cst_36 = arith.constant dense<0.000000e+00> : vector<2x8xf32>
    %92 = vector.multi_reduction <add>, %91, %cst_36 [2] : vector<2x8x8xf32> to vector<2x8xf32>
    %93 = vector.shape_cast %92 : vector<2x8xf32> to vector<2x8x1xf32>
    %94 = arith.truncf %91 : vector<2x8x8xf32> to vector<2x8x8xbf16>
    %cst_37 = arith.constant dense<0.000000e+00> : vector<2x8x8xf32>
    %95 = tpu.matmul %94, %85, %cst_37 {dimension_numbers = #tpu.dot_dimension_numbers<[2], [1], [1], [2], [0, 0, 0, 1, 1, 2], [0], [0]>} : vector<2x8x8xbf16>, vector<2x8x8xbf16>, vector<2x8x8xf32> -> vector<2x8x8xf32>
    %96 = tpu.reciprocal %93 {approx = true} : vector<2x8x1xf32> -> vector<2x8x1xf32>
    %97 = vector.broadcast %96 : vector<2x8x1xf32> to vector<2x8x8xf32>
    %98 = arith.mulf %95, %97 : vector<2x8x8xf32>
    %99 = vector.shape_cast %98 : vector<2x8x8xf32> to vector<16x8xf32>
    %c0_38 = arith.constant 0 : index
    %c16 = arith.constant 16 : index
    %100 = vector.load %arg13[%c0_38, %c16] : memref<16x32xf32, #tpu.memory_space<vmem>>, vector<16x8xf32>
    tpu.vector_store %arg13[%c0_38, %c16], %99 {strides = array<i32>} : memref<16x32xf32, #tpu.memory_space<vmem>>, vector<16x8xf32>,
    %101 = vector.extract_strided_slice %14 {offsets = [0, 24], sizes = [16, 8], strides = [1, 1]} : vector<16x32xf32> to vector<16x8xf32>
    %102 = vector.shape_cast %101 : vector<16x8xf32> to vector<2x8x8xf32>
    %103 = arith.truncf %102 : vector<2x8x8xf32> to vector<2x8x8xbf16>
    %104 = vector.extract_strided_slice %21 {offsets = [0, 24], sizes = [16, 8], strides = [1, 1]} : vector<16x32xf32> to vector<16x8xf32>
    %105 = vector.shape_cast %104 : vector<16x8xf32> to vector<2x8x8xf32>
    %106 = arith.truncf %105 : vector<2x8x8xf32> to vector<2x8x8xbf16>
    %107 = vector.extract_strided_slice %28 {offsets = [0, 24], sizes = [16, 8], strides = [1, 1]} : vector<16x32xf32> to vector<16x8xf32>
    %108 = vector.shape_cast %107 : vector<16x8xf32> to vector<2x8x8xf32>
    %109 = arith.truncf %108 : vector<2x8x8xf32> to vector<2x8x8xbf16>
    %cst_39 = arith.constant dense<0.000000e+00> : vector<2x8x8xf32>
    %110 = tpu.matmul %103, %106, %cst_39 {dimension_numbers = #tpu.dot_dimension_numbers<[2], [2], [1], [1], [0, 0, 0, 1, 1, 1], [0], [0]>} : vector<2x8x8xbf16>, vector<2x8x8xbf16>, vector<2x8x8xf32> -> vector<2x8x8xf32>
    %cst_40 = arith.constant dense<0xFF800000> : vector<2x8xf32>
    %111 = vector.multi_reduction <maximumf>, %110, %cst_40 [2] : vector<2x8x8xf32> to vector<2x8xf32>
    %112 = vector.shape_cast %111 : vector<2x8xf32> to vector<2x8x1xf32>
    %113 = vector.broadcast %112 : vector<2x8x1xf32> to vector<2x8x8xf32>
    %114 = arith.subf %110, %113 : vector<2x8x8xf32>
    %115 = math.exp %114 : vector<2x8x8xf32>
    %cst_41 = arith.constant dense<0.000000e+00> : vector<2x8xf32>
    %116 = vector.multi_reduction <add>, %115, %cst_41 [2] : vector<2x8x8xf32> to vector<2x8xf32>
    %117 = vector.shape_cast %116 : vector<2x8xf32> to vector<2x8x1xf32>
    %118 = arith.truncf %115 : vector<2x8x8xf32> to vector<2x8x8xbf16>
    %cst_42 = arith.constant dense<0.000000e+00> : vector<2x8x8xf32>
    %119 = tpu.matmul %118, %109, %cst_42 {dimension_numbers = #tpu.dot_dimension_numbers<[2], [1], [1], [2], [0, 0, 0, 1, 1, 2], [0], [0]>} : vector<2x8x8xbf16>, vector<2x8x8xbf16>, vector<2x8x8xf32> -> vector<2x8x8xf32>
    %120 = tpu.reciprocal %117 {approx = true} : vector<2x8x1xf32> -> vector<2x8x1xf32>
    %121 = vector.broadcast %120 : vector<2x8x1xf32> to vector<2x8x8xf32>
    %122 = arith.mulf %119, %121 : vector<2x8x8xf32>
    %123 = vector.shape_cast %122 : vector<2x8x8xf32> to vector<16x8xf32>
    %c0_43 = arith.constant 0 : index
    %c24 = arith.constant 24 : index
    %124 = vector.load %arg13[%c0_43, %c24] : memref<16x32xf32, #tpu.memory_space<vmem>>, vector<16x8xf32>
    tpu.vector_store %arg13[%c0_43, %c24], %123 {strides = array<i32>} : memref<16x32xf32, #tpu.memory_space<vmem>>, vector<16x8xf32>,
    %c0_44 = arith.constant 0 : index
    %c0_45 = arith.constant 0 : index
    %125 = vector.load %arg13[%c0_44, %c0_45] : memref<16x32xf32, #tpu.memory_space<vmem>>, vector<16x32xf32>
    %126 = arith.truncf %125 : vector<16x32xf32> to vector<16x32xbf16>
    %c0_46 = arith.constant 0 : index
    %c0_47 = arith.constant 0 : index
    %127 = vector.load %arg10[%c0_46, %c0_47] : memref<32x32xf32, #tpu.memory_space<vmem>>, vector<32x32xf32>
    %128 = arith.truncf %127 : vector<32x32xf32> to vector<32x32xbf16>
    %cst_48 = arith.constant dense<0.000000e+00> : vector<16x32xf32>
    %129 = tpu.matmul %126, %128, %cst_48 {dimension_numbers = #tpu.dot_dimension_numbers<[1], [0], [0], [1], [0, 0, 1, 1], [], []>} : vector<16x32xbf16>, vector<32x32xbf16>, vector<16x32xf32> -> vector<16x32xf32>
    %c0_49 = arith.constant 0 : index
    %c0_50 = arith.constant 0 : index
    %130 = vector.load %arg11[%c0_49, %c0_50] : memref<1x32xf32, #tpu.memory_space<vmem>>, vector<1x32xf32>
    %131 = vector.broadcast %130 : vector<1x32xf32> to vector<16x32xf32>
    %132 = arith.addf %129, %131 : vector<16x32xf32>
    %133 = vector.shape_cast %132 : vector<16x32xf32> to vector<2x8x32xf32>
    %c0_51 = arith.constant 0 : index
    %c0_52 = arith.constant 0 : index
    %c0_53 = arith.constant 0 : index
    %134 = vector.load %arg12[%c0_51, %c0_52, %c0_53] : memref<2x8x32xf32, #tpu.memory_space<vmem>>, vector<2x8x32xf32>
    tpu.vector_store %arg12[%c0_51, %c0_52, %c0_53], %133 {strides = array<i32>} : memref<2x8x32xf32, #tpu.memory_space<vmem>>, vector<2x8x32xf32>,
    return
  }
  func.func @transform_0(%arg0: i32) -> (i32, i32, i32) {
    %c0_i32 = arith.constant 0 : i32
    %c0_i32_0 = arith.constant 0 : i32
    %c0_i32_1 = arith.constant 0 : i32
    return %arg0, %c0_i32, %c0_i32_0 : i32, i32, i32
  }
  func.func @transform_1(%arg0: i32) -> (i32, i32, i32) {
    %c0_i32 = arith.constant 0 : i32
    %c0_i32_0 = arith.constant 0 : i32
    %c0_i32_1 = arith.constant 0 : i32
    return %arg0, %c0_i32, %c0_i32_0 : i32, i32, i32
  }
  func.func @transform_2(%arg0: i32) -> (i32, i32, i32) {
    %c0_i32 = arith.constant 0 : i32
    %c0_i32_0 = arith.constant 0 : i32
    %c0_i32_1 = arith.constant 0 : i32
    return %arg0, %c0_i32, %c0_i32_0 : i32, i32, i32
  }
  func.func @transform_3(%arg0: i32) -> (i32, i32) {
    %c0_i32 = arith.constant 0 : i32
    %c0_i32_0 = arith.constant 0 : i32
    %c0_i32_1 = arith.constant 0 : i32
    return %c0_i32, %c0_i32_0 : i32, i32
  }
  func.func @transform_4(%arg0: i32) -> (i32, i32) {
    %c0_i32 = arith.constant 0 : i32
    %c0_i32_0 = arith.constant 0 : i32
    %c0_i32_1 = arith.constant 0 : i32
    return %c0_i32, %c0_i32_0 : i32, i32
  }
  func.func @transform_5(%arg0: i32) -> (i32, i32) {
    %c0_i32 = arith.constant 0 : i32
    %c0_i32_0 = arith.constant 0 : i32
    %c0_i32_1 = arith.constant 0 : i32
    return %c0_i32, %c0_i32_0 : i32, i32
  }
  func.func @transform_6(%arg0: i32) -> (i32, i32) {
    %c0_i32 = arith.constant 0 : i32
    %c0_i32_0 = arith.constant 0 : i32
    %c0_i32_1 = arith.constant 0 : i32
    return %c0_i32, %c0_i32_0 : i32, i32
  }
  func.func @transform_7(%arg0: i32) -> (i32, i32) {
    %c0_i32 = arith.constant 0 : i32
    %c0_i32_0 = arith.constant 0 : i32
    %c0_i32_1 = arith.constant 0 : i32
    return %c0_i32, %c0_i32_0 : i32, i32
  }
  func.func @transform_8(%arg0: i32) -> (i32, i32) {
    %c0_i32 = arith.constant 0 : i32
    %c0_i32_0 = arith.constant 0 : i32
    %c0_i32_1 = arith.constant 0 : i32
    return %c0_i32, %c0_i32_0 : i32, i32
  }
  func.func @transform_9(%arg0: i32) -> (i32, i32) {
    %c0_i32 = arith.constant 0 : i32
    %c0_i32_0 = arith.constant 0 : i32
    %c0_i32_1 = arith.constant 0 : i32
    return %c0_i32, %c0_i32_0 : i32, i32
  }
  func.func @transform_10(%arg0: i32) -> (i32, i32) {
    %c0_i32 = arith.constant 0 : i32
    %c0_i32_0 = arith.constant 0 : i32
    %c0_i32_1 = arith.constant 0 : i32
    return %c0_i32, %c0_i32_0 : i32, i32
  }
  func.func @transform_11(%arg0: i32) -> (i32, i32, i32) {
    %c0_i32 = arith.constant 0 : i32
    %c0_i32_0 = arith.constant 0 : i32
    %c0_i32_1 = arith.constant 0 : i32
    return %arg0, %c0_i32, %c0_i32_0 : i32, i32, i32
  }
}

</mosaic_0001>

<bundles_post_ra>
// kernel: multi_headed_attention.1
= control target key start
LH: loop header
LB: loop body
LE: loop exit
PB: predicated region body
PF: predicated region fallthrough
CT: control target
= control target key end

     0   :  { %16 = vsyncpa [#allocation4], 0  ;;  %s2048_s0 = inlined_call_operand.vmem [shape: f32[2,8,32], index: 0, kind: input, shape index: {}]   ;;  %s2049_s1 = inlined_call_operand.hbm [shape: f32[2,8,32], index: 1, kind: input, shape index: {}]   ;;  %s2050_s2 = inlined_call_operand.hbm [shape: f32[2,8,32], index: 2, kind: input, shape index: {}]   ;;  %s2051_s3 = inlined_call_operand.hbm [shape: f32[32,32], index: 3, kind: input, shape index: {}]   ;;  %s2052_s4 = inlined_call_operand.vmem [shape: f32[1,32], index: 4, kind: input, shape index: {}]   ;;  %s2053_s5 = inlined_call_operand.hbm [shape: f32[32,32], index: 5, kind: input, shape index: {}]   ;;  %s2054_s6 = inlined_call_operand.vmem [shape: f32[1,32], index: 6, kind: input, shape index: {}]   ;;  %s2055_s7 = inlined_call_operand.hbm [shape: f32[32,32], index: 7, kind: input, shape index: {}]   ;;  %s2056_s8 = inlined_call_operand.vmem [shape: f32[1,32], index: 8, kind: input, shape index: {}]   ;;  %s2057_s9 = inlined_call_operand.hbm [shape: f32[32,32], index: 9, kind: input, shape index: {}]   ;;  %s2058_s10 = inlined_call_operand.vmem [shape: f32[1,32], index: 10, kind: input, shape index: {}]   ;;  %s2059_s11 = inlined_call_operand.hbm [shape: f32[2,8,32], index: 11, kind: output, shape index: {}]  }
   0x1   :  { %17 = vsyncpa [#allocation7], 0 }
   0x2   :  { %18 = vsyncpa [#allocation10], 0 }
   0x3   :  { %19 = vsyncpa [#allocation13], 0 }
   0x4   :  { %20 = vsyncpa [#allocation5], 0  ;;  %s1698_s17 = smov [#allocation6]   ;;  %s1699_s19 = smov [#allocation9]  }
   0x5   :  { %s40_s18 = sshll.u32 %s1698_s17, 4  ;;  %s66_s20 = sshll.u32 %s1699_s19, 4  ;;  %s41_s18 = int_to_ptr.vmem [resolvable:$true] %s40_s18  ;;  %s67_s20 = int_to_ptr.vmem [resolvable:$true] %s66_s20 }
   0x6   :  { %s1556_s21 = scalar_lea.vmem %s41_s18, 256  ;;  %p1561_p1 = scmp.lt.s32.totalorder %s41_s18, %s41_s18 }
   0x7   :  { %p1557_p0 = scmp.ne.s32.totalorder %s41_s18, %s1556_s21  ;;  %p1562_p2 = scmp.lt.s32.totalorder %s1556_s21, %s1556_s21 }
   0x9   :  { %p1563_p3 = por %p1562_p2, %p1561_p1 }
   0xb   :  { %p1564_p4 = pnand %p1563_p3, %p1557_p0 }
   0xd   :  { %1567 = shalt.err (!%p1564_p4)
}
   0xe   :  { %s1700_s22 = smov 128   ;;  %s1701_s23 = smov 8  }
   0xf   :  { %46 = dma.hbm_to_vmem [thread:$0]  %s2050_s2, 256, %s41_s18, [#allocation7], %s1700_s22, %s1700_s22, %s1701_s23  }
  0x10   :  { %s1576_s26 = scalar_lea.vmem %s67_s20, 512  ;;  %p1581_p6 = scmp.lt.s32.totalorder %s67_s20, %s67_s20 }
  0x11   :  { %p1577_p5 = scmp.ne.s32.totalorder %s67_s20, %s1576_s26  ;;  %p1582_p7 = scmp.lt.s32.totalorder %s1576_s26, %s1576_s26 }
  0x13   :  { %p1583_p8 = por %p1582_p7, %p1581_p6 }
  0x15   :  { %p1584_p9 = pnand %p1583_p8, %p1577_p5 }
  0x17   :  { %1587 = shalt.err (!%p1584_p9)
}
  0x18   :  { %72 = dma.hbm_to_vmem [thread:$0]  %s2053_s5, 512, %s67_s20, [#allocation10], %s1700_s22, %s1700_s22, %s1701_s23  }
  0x19   :  { %s1702_s29 = smov [#allocation3]   ;;  %s1703_s12 = smov [#allocation8]  }
  0x1a   :  { %s28_s30 = sshll.u32 %s1702_s29, 4  ;;  %s52_s13 = sshll.u32 %s1703_s12, 4  ;;  %s29_s30 = int_to_ptr.vmem [resolvable:$true] %s28_s30  ;;  %s53_s13 = int_to_ptr.vmem [resolvable:$true] %s52_s13 }
  0x1b   :  { %s1596_s2 = scalar_lea.vmem %s29_s30, 256  ;;  %p1601_p11 = scmp.lt.s32.totalorder %s29_s30, %s29_s30 }
  0x1c   :  { %p1597_p10 = scmp.ne.s32.totalorder %s29_s30, %s1596_s2  ;;  %p1602_p12 = scmp.lt.s32.totalorder %s1596_s2, %s1596_s2 }
  0x1e   :  { %p1603_p13 = por %p1602_p12, %p1601_p11 }
  0x20   :  { %p1604_p0 = pnand %p1603_p13, %p1597_p10 }
  0x22   :  { %1607 = shalt.err (!%p1604_p0)
}
  0x23   :  { %34 = dma.hbm_to_vmem [thread:$0]  %s2049_s1, 256, %s29_s30, [#allocation4], %s1700_s22, %s1700_s22, %s1701_s23  }
  0x24   :  { %s1616_s5 = scalar_lea.vmem %s53_s13, 512  ;;  %p1621_p2 = scmp.lt.s32.totalorder %s53_s13, %s53_s13 }
  0x25   :  { %p1617_p1 = scmp.ne.s32.totalorder %s53_s13, %s1616_s5  ;;  %p1622_p3 = scmp.lt.s32.totalorder %s1616_s5, %s1616_s5 }
  0x27   :  { %p1623_p4 = por %p1622_p3, %p1621_p2 }
  0x29   :  { %p1624_p5 = pnand %p1623_p4, %p1617_p1 }
  0x2b   :  { %1627 = shalt.err (!%p1624_p5)
}
  0x2c   :  { %58 = dma.hbm_to_vmem [thread:$0]  %s2051_s3, 512, %s53_s13, [#allocation7], %s1700_s22, %s1700_s22, %s1701_s23  }
  0x2d   :  { %s1704_s18 = smov [#allocation11]   ;;  %s1705_s20 = smov [#allocation12]  }
  0x2e   :  { %s80_s19 = sshll.u32 %s1704_s18, 4  ;;  %s94_s21 = sshll.u32 %s1705_s20, 4  ;;  %s81_s19 = int_to_ptr.vmem [resolvable:$true] %s80_s19  ;;  %s95_s21 = int_to_ptr.vmem [resolvable:$true] %s94_s21 }
  0x2f   :  { %s1636_s1 = scalar_lea.vmem %s81_s19, 512  ;;  %p1641_p7 = scmp.lt.s32.totalorder %s81_s19, %s81_s19 }
  0x30   :  { %p1637_p6 = scmp.ne.s32.totalorder %s81_s19, %s1636_s1  ;;  %p1642_p8 = scmp.lt.s32.totalorder %s1636_s1, %s1636_s1 }
  0x32   :  { %p1643_p9 = por %p1642_p8, %p1641_p7 }
  0x34   :  { %p1644_p10 = pnand %p1643_p9, %p1637_p6 }
  0x36   :  { %1647 = shalt.err (!%p1644_p10)
}
  0x37   :  { %86 = dma.hbm_to_vmem [thread:$0]  %s2055_s7, 512, %s81_s19, [#allocation10], %s1700_s22, %s1700_s22, %s1701_s23  }
  0x38   :  { %s1656_s3 = scalar_lea.vmem %s95_s21, 512  ;;  %p1661_p12 = scmp.lt.s32.totalorder %s95_s21, %s95_s21 }
  0x39   :  { %p1657_p11 = scmp.ne.s32.totalorder %s95_s21, %s1656_s3  ;;  %p1662_p13 = scmp.lt.s32.totalorder %s1656_s3, %s1656_s3 }
  0x3b   :  { %p1663_p0 = por %p1662_p13, %p1661_p12 }
  0x3d   :  { %p1664_p1 = pnand %p1663_p0, %p1657_p11 }
  0x3f   :  { %1667 = shalt.err (!%p1664_p1)
}
  0x40   :  { %100 = dma.hbm_to_vmem [thread:$0]  %s2057_s9, 512, %s95_s21, [#allocation13], %s1700_s22, %s1700_s22, %s1701_s23  }
  0x41   :  { %1688 = dma.done.wait [#allocation4], 256  }
  0x42   :  { %1689 = vsyncadd [#allocation4], 4294967040 }
  0x43   :  { %1690 = dma.done.wait [#allocation7], 768  }
  0x44   :  { %1691 = vsyncadd [#allocation7], 4294966528 }
  0x45   :  { %1692 = dma.done.wait [#allocation10], 1024  }
  0x46   :  { %1693 = vsyncadd [#allocation10], 4294966272 }
  0x47   :  { %1694 = dma.done.wait [#allocation13], 512  }
  0x48   :  { %1695 = vsyncadd [#allocation13], 4294966784  ;;  %v1706_v0 = vmov 0.0   ;;  %vm1707_vm0 = vmmov 0   ;;  %v192_v1 = vld [vmem:[#allocation9 + $0x10] sm:$0xff]  ;;  %v193_v2 = vld [vmem:[#allocation9 + $0x18] sm:$0xff] }
  0x49   :  { %1380 = vmatprep.subr.bf16.mxu1 %v1706_v0  ;;  %1372 = vmatprep.subr.bf16.mxu0 %v1706_v0  ;;  %v131_v3 = vld [vmem:[#allocation8 + $0x10] sm:$0xff]  ;;  %v195_v4 = vpack.c.bf16 %v193_v2, %v192_v1  ;;  %v132_v5 = vld [vmem:[#allocation8 + $0x18] sm:$0xff]  ;;  %v190_v6 = vld [vmem:[#allocation9] sm:$0xff]  ;;  %vm142_vm1 = vcmask 261120   ;;  %vm311_vm2 = vcmask 64512   ;;  %s1708_s2 = smov 120  }
  0x4a   :  { %1384 = vmatprep.mubr.msk.bf16.mxu1 %vm1707_vm0, %v1706_v0  ;;  %1376 = vmatprep.mubr.msk.bf16.mxu0 %vm1707_vm0, %v1706_v0  ;;  %v191_v7 = vld [vmem:[#allocation9 + $0x8] sm:$0xff]  ;;  %v134_v8 = vpack.c.bf16 %v132_v5, %v131_v3  ;;  %v129_v9 = vld [vmem:[#allocation8] sm:$0xff]  ;;  %v122_v15 = vld [vmem:[%s2048_s0] sm:$0xff]  ;;  %vm427_vm3 = vcmask 1043456   ;;  %s1710_s14 = smov 104   ;;  %s1711_s15 = smov 16  }
  0x4b   :  { %v130_v10 = vld [vmem:[#allocation8 + $0x8] sm:$0xff]  ;;  %1381 = vmatpush3.bf16.msra.mxu1 %v195_v4  ;;  %v194_v11 = vpack.c.bf16 %v191_v7, %v190_v6  ;;  %v124_v12 = vld [vmem:[#allocation3] sm:$0xff]  ;;  %v123_v16 = vld [vmem:[%s2048_s0 + $0x8] sm:$0xff]  ;;  %vm757_vm4 = vcmask 130112   ;;  %vm988_vm5 = vcmask 195712   ;;  %s1712_s5 = smov 24  }
  0x4c   :  { %v125_v13 = vld [vmem:[#allocation3 + $0x8] sm:$0xff]  ;;  %1373 = vmatpush3.bf16.msra.mxu0 %v134_v8  ;;  %1382 = vmatprep.subr.bf16.mxu1 %v1706_v0  ;;  %v133_v14 = vpack.c.bf16 %v130_v10, %v129_v9  ;;  %v250_v17 = vld [vmem:[#allocation11 + $0x10] sm:$0xff]  ;;  %v251_v18 = vld [vmem:[#allocation11 + $0x18] sm:$0xff]  ;;  %v128_v20 = vpack.c.bf16 %v123_v16, %v122_v15  ;;  %vm1219_vm6 = vcmask 261312   ;;  %s1713_s18 = smov [#allocation14]  }
  0x4d   :  { %1374 = vmatprep.subr.bf16.mxu0 %v1706_v0  ;;  %v189_v19 = vpack.c.bf16 %v125_v13, %v124_v12  ;;  %v253_v21 = vpack.c.bf16 %v251_v18, %v250_v17  ;;  %v248_v22 = vld [vmem:[#allocation11] sm:$0xff]  ;;  %v249_v23 = vld [vmem:[#allocation11 + $0x8] sm:$0xff]  ;;  %v126_v25 = vld [vmem:[#allocation6] sm:$0xff]  ;;  %s1289_s19 = sshll.u32 %s1713_s18, 4  ;;  %s1290_s19 = int_to_ptr.vmem [resolvable:$true] %s1289_s19 }
  0x4e   :  { %v252_v24 = vpack.c.bf16 %v249_v23, %v248_v22  ;;  %v127_v26 = vld [vmem:[#allocation6 + $0x8] sm:$0xff]  ;;  %v1306_v28 = vld [vmem:[%s2054_s6] ss:$0 sm:$0xff]  ;;  %s1668_s20 = scalar_lea.vmem %s1290_s19, 256  ;;  %p1673_p3 = scmp.lt.s32.totalorder %s1290_s19, %s1290_s19 }
  0x4f   :  { %1383 = vmatpush3.bf16.msra.mxu1 %v194_v11  ;;  %v247_v27 = vpack.c.bf16 %v127_v26, %v126_v25  ;;  %v1304_v29 = vld [vmem:[%s2052_s4] ss:$0 sm:$0xff]  ;;  %p1669_p2 = scmp.ne.s32.totalorder %s1290_s19, %s1668_s20  ;;  %p1674_p4 = scmp.lt.s32.totalorder %s1668_s20, %s1668_s20 }
  0x50   :  { %1375 = vmatpush3.bf16.msra.mxu0 %v133_v14  ;;  %1396 = vmatprep.subr.bf16.mxu1 %v1706_v0  ;;  %v1308_v50 = vld [vmem:[%s2056_s8] ss:$0 sm:$0xff]  ;;  %s1709_s8 = smov 112  }
  0x51   :  { %1388 = vmatprep.subr.bf16.mxu0 %v1706_v0  ;;  %p1675_p5 = por %p1674_p4, %p1673_p3 }
  0x52   :  { %1385 = vmatmul.mubr.msk.bf16.vlgmr.msra.gmra.mxu1 %vm142_vm1, %v189_v19 }
  0x53   :  { %1377 = vmatmul.mubr.msk.bf16.vlgmr.msra.gmra.mxu0 %vm142_vm1, %v128_v20  ;;  %1398 = vmatprep.mubr.msk.bf16.mxu1 %vm1707_vm0, %v1706_v0  ;;  %p1676_p6 = pnand %p1675_p5, %p1669_p2 }
  0x54   :  { %1389 = vmatpush3.bf16.msra.mxu0 %v253_v21  ;;  %1392 = vmatprep.mubr.msk.bf16.mxu0 %vm1707_vm0, %v1706_v0 }
  0x55   :  { %1390 = vmatprep.subr.bf16.mxu0 %v1706_v0 }
  0x58   :  { %1391 = vmatpush3.bf16.msra.mxu0 %v252_v24 }
  0x59   :  { %1402 = vmatprep.subr.bf16.mxu0 %v1706_v0 }
  0x5b   :  { %1393 = vmatmul.mubr.msk.bf16.vlgmr.msra.gmra.mxu0 %vm142_vm1, %v247_v27 }
  0x5c   :  { %1404 = vmatprep.mubr.msk.bf16.mxu0 %vm1707_vm0, %v1706_v0 }
 0x112   :  { %v240_v30 = vpop.f32.mrf.mxu1 }
 0x113   :  { %v241_v31 = vadd.f32 %v1306_v28, %v240_v30  ;;  %v180_v32 = vpop.f32.mrf.mxu0 }
 0x114   :  { %v181_v33 = vadd.f32 %v1304_v29, %v180_v32  ;;  %v1386_v34 = vpop.f32.mrf.mxu1 }
 0x115   :  { %v1843_v35 = vpack.c.bf16 %v241_v31, %v241_v31  ;;  %v1378_v36 = vpop.f32.mrf.mxu0 }
 0x116   :  { %v243_v37 = vpop.f32.mrf.mxu1  ;;  %v187_v38 = vmul.f32 0.35355338, %v181_v33 }
 0x117   :  { %v244_v39 = vadd.f32 %v1306_v28, %v243_v37  ;;  %527 = vrot.lane.b32.xlu1 %v1843_v35, %s1708_s2  ;;  %v183_v40 = vpop.f32.mrf.mxu0  ;;  %v316_v41 = vsel %vm311_vm2, %v1843_v35, 0 }
 0x118   :  { %v184_v42 = vadd.f32 %v1304_v29, %v183_v40  ;;  %v1387_v43 = vpop.f32.mrf.mxu1  ;;  %1397 = vmatpush3.bf16.xpose.msra.mxu1 %v316_v41  ;;  %v1852_v47 = vpack.c.bf16 %v187_v38, %v187_v38 }
 0x119   :  { %v1849_v44 = vpack.c.bf16 %v244_v39, %v244_v39  ;;  %v1379_v45 = vpop.f32.mrf.mxu0  ;;  %1408 = vmatprep.subr.bf16.mxu1 %v1706_v0 }
 0x11a   :  { %v188_v46 = vmul.f32 0.35355338, %v184_v42 }
 0x11b   :  { %579 = vrot.lane.b32.xlu1 %v1849_v44, %s1708_s2  ;;  %v362_v48 = vsel %vm311_vm2, %v1849_v44, 0  ;;  %v298_v51 = vpop.f32.mrf.mxu0 }
 0x11c   :  { %v1858_v49 = vpack.c.bf16 %v188_v46, %v188_v46  ;;  %1403 = vmatpush3.bf16.xpose.msra.mxu0 %v362_v48  ;;  %v299_v52 = vadd.f32 %v1308_v50, %v298_v51 }
 0x11d   :  { %1414 = vmatprep.subr.bf16.mxu0 %v1706_v0  ;;  %v1394_v53 = vpop.f32.mrf.mxu0 }
 0x11e   :  { %v1874_v54 = vpack.c.bf16 %v299_v52, %v299_v52 }
 0x11f   :  { %1399 = vmatmul.mubr.msk.bf16.vlgmr.msra.gmra.mxu1 %vm311_vm2, %v1852_v47  ;;  %576 = vrot.lane.b32.xlu1 %v1858_v49, %s1708_s2  ;;  %v301_v55 = vpop.f32.mrf.mxu0 }
 0x120   :  { %1410 = vmatprep.mubr.msk.bf16.mxu1 %vm1707_vm0, %v1706_v0  ;;  %v302_v56 = vadd.f32 %v1308_v50, %v301_v55  ;;  %v429_v59 = vsel %vm427_vm3, %v1874_v54, 0 }
 0x121   :  { %v1395_v57 = vpop.f32.mrf.mxu0  ;;  %1409 = vmatpush3.bf16.msra.mxu1 %v429_v59 }
 0x122   :  { %v1878_v58 = vpack.c.bf16 %v302_v56, %v302_v56  ;;  %1420 = vmatprep.subr.bf16.mxu1 %v1706_v0 }
 0x123   :  { %1405 = vmatmul.mubr.msk.bf16.vlgmr.msra.gmra.mxu0 %vm311_vm2, %v1858_v49  ;;  %648 = vrot.lane.b32.xlu1 %v1874_v54, %s1708_s2 }
 0x124   :  { %1416 = vmatprep.mubr.msk.bf16.mxu0 %vm1707_vm0, %v1706_v0  ;;  %v475_v60 = vsel %vm427_vm3, %v1878_v58, 0 }
 0x125   :  { %1415 = vmatpush3.bf16.msra.mxu0 %v475_v60 }
 0x126   :  { %1426 = vmatprep.subr.bf16.mxu0 %v1706_v0 }
 0x189   :  { %v528_v14 = vpop.permute.xlu1 %527 }
 0x18a   :  { %v533_v18 = vsel %vm311_vm2, %v528_v14, 0 }
 0x18d   :  { %v580_v15 = vpop.permute.xlu1 %579 }
 0x18e   :  { %v585_v22 = vsel %vm311_vm2, %v580_v15, 0 }
 0x191   :  { %v577_v20 = vpop.permute.xlu1 %576 }
 0x195   :  { %v649_v23 = vpop.permute.xlu1 %648 }
 0x196   :  { %v654_v25 = vsel %vm427_vm3, %v649_v23, 0 }
 0x1df   :  { %v352_v61 = vpop.f32.mrf.mxu1 }
 0x1e0   :  { %v404_v62 = vsel %vm311_vm2, %v352_v61, -inf }
 0x1e1   :  { %405 = vmax.xlane.f32.xlu0 %v404_v62  ;;  %v1400_v63 = vpop.f32.mrf.mxu1 }
 0x1e3   :  { %v355_v1 = vpop.f32.mrf.mxu1  ;;  %v398_v2 = vpop.f32.mrf.mxu0 }
 0x1e4   :  { %v407_v3 = vsel %vm311_vm2, %v398_v2, -inf }
 0x1e5   :  { %v1401_v4 = vpop.f32.mrf.mxu1  ;;  %408 = vmax.xlane.f32.xlu0 %v407_v3  ;;  %v1406_v5 = vpop.f32.mrf.mxu0 }
 0x1e7   :  { %v401_v6 = vpop.f32.mrf.mxu0 }
 0x1e9   :  { %v1407_v7 = vpop.f32.mrf.mxu0 }
 0x1fb   :  { %524 = vrot.lane.b32.xlu0 %v1852_v47, %s1708_s2 }
 0x26a   :  { %v406_v8 = vpop.xlane.xlu0 %405 }
 0x26b   :  { %v410_v9 = vsub.f32 %v352_v61, %v406_v8 }
 0x26d   :  { %v412_v10 = vmul.f32 1.442695, %v410_v9 }
 0x26e   :  { %v409_v11 = vpop.xlane.xlu0 %408 }
 0x26f   :  { %1516 = vpow2.f32 %v412_v10  ;;  %v411_v12 = vsub.f32 %v398_v2, %v409_v11 }
 0x271   :  { %v414_v13 = vmul.f32 1.442695, %v411_v12 }
 0x272   :  { %v525_v24 = vpop.permute.xlu0 %524 }
 0x273   :  { %1518 = vpow2.f32 %v414_v13 }
 0x27c   :  { %v1890_v16 = vpop.eup %1516 }
 0x27d   :  { %v422_v17 = vpack.c.bf16 %v1890_v16, %v1890_v16 }
 0x27f   :  { %1411 = vmatmul.mubr.msk.bf16.vlgmr.msra.gmra.mxu1 %vm311_vm2, %v422_v17 }
 0x280   :  { %v1896_v19 = vpop.eup %1518  ;;  %1421 = vmatpush3.bf16.xpose.msra.mxu1 %v533_v18  ;;  %1422 = vmatprep.mubr.msk.bf16.mxu1 %vm1707_vm0, %v1706_v0 }
 0x281   :  { %v423_v21 = vpack.c.bf16 %v1896_v19, %v1896_v19  ;;  %1432 = vmatprep.subr.bf16.mxu1 %v1706_v0 }
 0x283   :  { %1417 = vmatmul.mubr.msk.bf16.vlgmr.msra.gmra.mxu0 %vm311_vm2, %v423_v21 }
 0x284   :  { %1427 = vmatpush3.bf16.xpose.msra.mxu0 %v585_v22  ;;  %1428 = vmatprep.mubr.msk.bf16.mxu0 %vm1707_vm0, %v1706_v0 }
 0x285   :  { %1438 = vmatprep.subr.bf16.mxu0 %v1706_v0 }
 0x287   :  { %1423 = vmatmul.mubr.msk.bf16.vlgmr.msra.gmra.mxu1 %vm311_vm2, %v525_v24 }
 0x288   :  { %1433 = vmatpush3.bf16.msra.mxu1 %v654_v25  ;;  %1434 = vmatprep.mubr.msk.bf16.mxu1 %vm1707_vm0, %v1706_v0 }
 0x289   :  { %1444 = vmatprep.subr.bf16.mxu1 %v1706_v0 }
 0x28b   :  { %1429 = vmatmul.mubr.msk.bf16.vlgmr.msra.gmra.mxu0 %vm311_vm2, %v577_v20 }
 0x28c   :  { %1440 = vmatprep.mubr.msk.bf16.mxu0 %vm1707_vm0, %v1706_v0 }
 0x33f   :  { %v1916_v26 = vpop.f32.mrf.mxu1 }
 0x341   :  { %v1412_v27 = vpop.f32.mrf.mxu1 }
 0x343   :  { %v468_v28 = vpop.f32.mrf.mxu1  ;;  %v1918_v29 = vpop.f32.mrf.mxu0 }
 0x345   :  { %v1413_v30 = vpop.f32.mrf.mxu1  ;;  %v1418_v31 = vpop.f32.mrf.mxu0 }
 0x347   :  { %v514_v32 = vpop.f32.mrf.mxu0  ;;  %v569_v33 = vpop.f32.mrf.mxu1 }
 0x348   :  { %v627_v34 = vsel %vm311_vm2, %v569_v33, -inf }
 0x349   :  { %628 = vmax.xlane.f32.xlu1 %v627_v34  ;;  %v1419_v36 = vpop.f32.mrf.mxu0  ;;  %v1424_v37 = vpop.f32.mrf.mxu1 }
 0x34b   :  { %v572_v38 = vpop.f32.mrf.mxu1  ;;  %v621_v39 = vpop.f32.mrf.mxu0 }
 0x34c   :  { %v630_v40 = vsel %vm311_vm2, %v621_v39, -inf }
 0x34d   :  { %v1425_v41 = vpop.f32.mrf.mxu1  ;;  %631 = vmax.xlane.f32.xlu0 %v630_v40  ;;  %v1430_v42 = vpop.f32.mrf.mxu0 }
 0x34f   :  { %v624_v43 = vpop.f32.mrf.mxu0 }
 0x351   :  { %v1431_v45 = vpop.f32.mrf.mxu0 }
 0x35a   :  { %762 = vrot.lane.b32.xlu1 %v1843_v35, %s1709_s8 }
 0x35e   :  { %812 = vrot.lane.b32.xlu1 %v1849_v44, %s1709_s8 }
 0x362   :  { %760 = vrot.lane.b32.xlu1 %v1852_v47, %s1709_s8 }
 0x363   :  { %697 = vrot.lane.b32.xlu0 %v1878_v58, %s1708_s2 }
 0x366   :  { %810 = vrot.lane.b32.xlu1 %v1858_v49, %s1709_s8 }
 0x3d2   :  { %v629_v46 = vpop.xlane.xlu1 %628 }
 0x3d3   :  { %v633_v48 = vsub.f32 %v569_v33, %v629_v46 }
 0x3d5   :  { %v635_v50 = vmul.f32 1.442695, %v633_v48 }
 0x3d6   :  { %v632_v51 = vpop.xlane.xlu0 %631  ;;  %v763_v57 = vpop.permute.xlu1 %762 }
 0x3d7   :  { %1520 = vpow2.f32 %v635_v50  ;;  %v634_v52 = vsub.f32 %v621_v39, %v632_v51  ;;  %v768_v62 = vsel %vm311_vm2, %v763_v57, 0 }
 0x3d9   :  { %v637_v53 = vmul.f32 1.442695, %v634_v52 }
 0x3da   :  { %v698_v55 = vpop.permute.xlu0 %697  ;;  %v813_v61 = vpop.permute.xlu1 %812 }
 0x3db   :  { %1522 = vpow2.f32 %v637_v53  ;;  %v703_v56 = vsel %vm427_vm3, %v698_v55, 0  ;;  %v818_v2 = vsel %vm311_vm2, %v813_v61, 0 }
 0x3dc   :  { %1439 = vmatpush3.bf16.msra.mxu0 %v703_v56 }
 0x3dd   :  { %1450 = vmatprep.subr.bf16.mxu0 %v1706_v0 }
 0x3de   :  { %v761_v3 = vpop.permute.xlu1 %760 }
 0x3e2   :  { %v811_v4 = vpop.permute.xlu1 %810 }
 0x3e4   :  { %v1934_v59 = vpop.eup %1520 }
 0x3e5   :  { %v645_v60 = vpack.c.bf16 %v1934_v59, %v1934_v59 }
 0x3e7   :  { %1435 = vmatmul.mubr.msk.bf16.vlgmr.msra.gmra.mxu1 %vm311_vm2, %v645_v60 }
 0x3e8   :  { %v1940_v63 = vpop.eup %1522  ;;  %1445 = vmatpush3.bf16.xpose.msra.mxu1 %v768_v62  ;;  %1446 = vmatprep.mubr.msk.bf16.mxu1 %vm1707_vm0, %v1706_v0 }
 0x3e9   :  { %v646_v1 = vpack.c.bf16 %v1940_v63, %v1940_v63  ;;  %1456 = vmatprep.subr.bf16.mxu1 %v1706_v0 }
 0x3eb   :  { %1441 = vmatmul.mubr.msk.bf16.vlgmr.msra.gmra.mxu0 %vm311_vm2, %v646_v1 }
 0x3ec   :  { %1451 = vmatpush3.bf16.xpose.msra.mxu0 %v818_v2  ;;  %1452 = vmatprep.mubr.msk.bf16.mxu0 %vm1707_vm0, %v1706_v0 }
 0x3ed   :  { %1462 = vmatprep.subr.bf16.mxu0 %v1706_v0 }
 0x3ef   :  { %1447 = vmatmul.mubr.msk.bf16.vlgmr.msra.gmra.mxu1 %vm311_vm2, %v761_v3 }
 0x3f0   :  { %1458 = vmatprep.mubr.msk.bf16.mxu1 %vm1707_vm0, %v1706_v0 }
 0x3f3   :  { %1453 = vmatmul.mubr.msk.bf16.vlgmr.msra.gmra.mxu0 %vm311_vm2, %v811_v4 }
 0x3f4   :  { %1464 = vmatprep.mubr.msk.bf16.mxu0 %vm1707_vm0, %v1706_v0 }
 0x4a7   :  { %v1958_v5 = vpop.f32.mrf.mxu1 }
 0x4a9   :  { %v1436_v6 = vpop.f32.mrf.mxu1 }
 0x4ab   :  { %v693_v7 = vpop.f32.mrf.mxu1  ;;  %v1960_v8 = vpop.f32.mrf.mxu0 }
 0x4ac   :  { %v639_v7 = vsel %vm311_vm2, %v1934_v59, 0.0 }
 0x4ad   :  { %v1437_v9 = vpop.f32.mrf.mxu1  ;;  %v1442_v10 = vpop.f32.mrf.mxu0 }
 0x4ae   :  { %v642_v10 = vsel %vm311_vm2, %v1940_v63, 0.0 }
 0x4af   :  { %v742_v11 = vpop.f32.mrf.mxu0  ;;  %v804_v12 = vpop.f32.mrf.mxu1 }
 0x4b0   :  { %v860_v13 = vsel %vm311_vm2, %v804_v12, -inf }
 0x4b1   :  { %861 = vmax.xlane.f32.xlu1 %v860_v13  ;;  %v1443_v14 = vpop.f32.mrf.mxu0  ;;  %v1448_v15 = vpop.f32.mrf.mxu1 }
 0x4b3   :  { %v807_v17 = vpop.f32.mrf.mxu1  ;;  %v854_v18 = vpop.f32.mrf.mxu0 }
 0x4b4   :  { %v863_v20 = vsel %vm311_vm2, %v854_v18, -inf }
 0x4b5   :  { %v1449_v21 = vpop.f32.mrf.mxu1  ;;  %864 = vmax.xlane.f32.xlu0 %v863_v20  ;;  %v1454_v22 = vpop.f32.mrf.mxu0 }
 0x4b7   :  { %v857_v23 = vpop.f32.mrf.mxu0 }
 0x4b9   :  { %v1455_v24 = vpop.f32.mrf.mxu0 }
 0x4ba   :  { %v416_v24 = vsel %vm311_vm2, %v1890_v16, 0.0 }
 0x4c2   :  { %928 = vrot.lane.b32.xlu1 %v1878_v58, %s1709_s8 }
 0x4c6   :  { %993 = vrot.lane.b32.xlu1 %v1843_v35, %s1710_s14 }
 0x4ca   :  { %991 = vrot.lane.b32.xlu1 %v1852_v47, %s1710_s14 }
 0x4cb   :  { %880 = vrot.lane.b32.xlu0 %v1874_v54, %s1709_s8 }
 0x4cf   :  { %1043 = vrot.lane.b32.xlu0 %v1849_v44, %s1710_s14 }
 0x4d3   :  { %1041 = vrot.lane.b32.xlu0 %v1858_v49, %s1710_s14 }
 0x53a   :  { %v862_v25 = vpop.xlane.xlu1 %861 }
 0x53b   :  { %v866_v27 = vsub.f32 %v804_v12, %v862_v25 }
 0x53d   :  { %v868_v28 = vmul.f32 1.442695, %v866_v27 }
 0x53e   :  { %v929_v30 = vpop.permute.xlu1 %928  ;;  %v865_v31 = vpop.xlane.xlu0 %864 }
 0x53f   :  { %1524 = vpow2.f32 %v868_v28  ;;  %v934_v35 = vsel %vm427_vm3, %v929_v30, 0  ;;  %v867_v32 = vsub.f32 %v854_v18, %v865_v31  ;;  %v419_v28 = vsel %vm311_vm2, %v1896_v19, 0.0 }
 0x540   :  { %1463 = vmatpush3.bf16.msra.mxu0 %v934_v35 }
 0x541   :  { %v870_v47 = vmul.f32 1.442695, %v867_v32  ;;  %1474 = vmatprep.subr.bf16.mxu0 %v1706_v0 }
 0x542   :  { %v881_v33 = vpop.permute.xlu0 %880  ;;  %v994_v34 = vpop.permute.xlu1 %993 }
 0x543   :  { %1526 = vpow2.f32 %v870_v47  ;;  %v886_v44 = vsel %vm427_vm3, %v881_v33, 0  ;;  %v999_v37 = vsel %vm311_vm2, %v994_v34, 0 }
 0x544   :  { %1457 = vmatpush3.bf16.msra.mxu1 %v886_v44 }
 0x545   :  { %1468 = vmatprep.subr.bf16.mxu1 %v1706_v0 }
 0x546   :  { %v1044_v39 = vpop.permute.xlu0 %1043  ;;  %v992_v42 = vpop.permute.xlu1 %991 }
 0x547   :  { %v1049_v41 = vsel %vm311_vm2, %v1044_v39, 0 }
 0x54a   :  { %v1042_v43 = vpop.permute.xlu0 %1041 }
 0x54c   :  { %v1525_v49 = vpop.eup %1524 }
 0x54d   :  { %v878_v36 = vpack.c.bf16 %v1525_v49, %v1525_v49  ;;  %v872_v11 = vsel %vm311_vm2, %v1525_v49, 0.0 }
 0x54f   :  { %1459 = vmatmul.mubr.msk.bf16.vlgmr.msra.gmra.mxu1 %vm311_vm2, %v878_v36 }
 0x550   :  { %v1527_v38 = vpop.eup %1526  ;;  %1469 = vmatpush3.bf16.xpose.msra.mxu1 %v999_v37  ;;  %1470 = vmatprep.mubr.msk.bf16.mxu1 %vm1707_vm0, %v1706_v0 }
 0x551   :  { %v879_v40 = vpack.c.bf16 %v1527_v38, %v1527_v38  ;;  %1480 = vmatprep.subr.bf16.mxu1 %v1706_v0  ;;  %v875_v9 = vsel %vm311_vm2, %v1527_v38, 0.0 }
 0x553   :  { %1465 = vmatmul.mubr.msk.bf16.vlgmr.msra.gmra.mxu0 %vm311_vm2, %v879_v40 }
 0x554   :  { %1475 = vmatpush3.bf16.xpose.msra.mxu0 %v1049_v41  ;;  %1476 = vmatprep.mubr.msk.bf16.mxu0 %vm1707_vm0, %v1706_v0 }
 0x555   :  { %1486 = vmatprep.subr.bf16.mxu0 %v1706_v0 }
 0x557   :  { %1471 = vmatmul.mubr.msk.bf16.vlgmr.msra.gmra.mxu1 %vm311_vm2, %v992_v42 }
 0x558   :  { %1482 = vmatprep.mubr.msk.bf16.mxu1 %vm1707_vm0, %v1706_v0 }
 0x55b   :  { %1477 = vmatmul.mubr.msk.bf16.vlgmr.msra.gmra.mxu0 %vm311_vm2, %v1042_v43 }
 0x55c   :  { %1488 = vmatprep.mubr.msk.bf16.mxu0 %vm1707_vm0, %v1706_v0 }
 0x60f   :  { %v1996_v45 = vpop.f32.mrf.mxu1 }
 0x611   :  { %v1460_v46 = vpop.f32.mrf.mxu1 }
 0x613   :  { %v925_v48 = vpop.f32.mrf.mxu1  ;;  %v1998_v50 = vpop.f32.mrf.mxu0 }
 0x615   :  { %v1461_v51 = vpop.f32.mrf.mxu1  ;;  %v1466_v52 = vpop.f32.mrf.mxu0 }
 0x616   :  { %v1225_v51 = vld [vmem:[#allocation12] sm:$0xff] }
 0x617   :  { %v973_v53 = vpop.f32.mrf.mxu0  ;;  %v1035_v55 = vpop.f32.mrf.mxu1 }
 0x618   :  { %v1091_v56 = vsel %vm311_vm2, %v1035_v55, -inf  ;;  %v1226_v53 = vld [vmem:[#allocation12 + $0x8] sm:$0xff] }
 0x619   :  { %1092 = vmax.xlane.f32.xlu1 %v1091_v56  ;;  %v1467_v57 = vpop.f32.mrf.mxu0  ;;  %v1472_v60 = vpop.f32.mrf.mxu1 }
 0x61b   :  { %v1038_v61 = vpop.f32.mrf.mxu1  ;;  %v1085_v62 = vpop.f32.mrf.mxu0 }
 0x61c   :  { %v1094_v1 = vsel %vm311_vm2, %v1085_v62, -inf }
 0x61d   :  { %v1473_v2 = vpop.f32.mrf.mxu1  ;;  %1095 = vmax.xlane.f32.xlu0 %v1094_v1  ;;  %v1478_v3 = vpop.f32.mrf.mxu0 }
 0x61f   :  { %v1088_v4 = vpop.f32.mrf.mxu0 }
 0x621   :  { %v1479_v6 = vpop.f32.mrf.mxu0 }
 0x62a   :  { %1159 = vrot.lane.b32.xlu1 %v1878_v58, %s1710_s14 }
 0x633   :  { %1111 = vrot.lane.b32.xlu0 %v1874_v54, %s1710_s14 }
 0x64e   :  { %640 = vadd.xlane.f32.xlu1 %v639_v7 }
 0x652   :  { %876 = vadd.xlane.f32.xlu1 %v875_v9  ;;  %643 = vadd.xlane.f32.xlu0 %v642_v10 }
 0x656   :  { %873 = vadd.xlane.f32.xlu0 %v872_v11 }
 0x6a2   :  { %v1093_v12 = vpop.xlane.xlu1 %1092 }
 0x6a3   :  { %v1097_v13 = vsub.f32 %v1035_v55, %v1093_v12 }
 0x6a5   :  { %v1099_v58 = vmul.f32 1.442695, %v1097_v13  ;;  %v1326_v13 = vld [vmem:[%s2058_s10] ss:$0 sm:$0xff] }
 0x6a6   :  { %v1160_v14 = vpop.permute.xlu1 %1159  ;;  %v1096_v15 = vpop.xlane.xlu0 %1095 }
 0x6a7   :  { %1528 = vpow2.f32 %v1099_v58  ;;  %v1165_v54 = vsel %vm427_vm3, %v1160_v14, 0  ;;  %v1098_v59 = vsub.f32 %v1085_v62, %v1096_v15 }
 0x6a8   :  { %1487 = vmatpush3.bf16.msra.mxu0 %v1165_v54 }
 0x6a9   :  { %v1101_v17 = vmul.f32 1.442695, %v1098_v59 }
 0x6aa   :  { %v1112_v18 = vpop.permute.xlu0 %1111 }
 0x6ab   :  { %1530 = vpow2.f32 %v1101_v17  ;;  %v1117_v63 = vsel %vm427_vm3, %v1112_v18, 0 }
 0x6ac   :  { %1481 = vmatpush3.bf16.msra.mxu1 %v1117_v63 }
 0x6ad   :  { %1492 = vmatprep.subr.bf16.mxu1 %v1706_v0 }
 0x6b4   :  { %v1529_v20 = vpop.eup %1528 }
 0x6b5   :  { %v1103_v21 = vsel %vm311_vm2, %v1529_v20, 0.0  ;;  %v1109_v22 = vpack.c.bf16 %v1529_v20, %v1529_v20 }
 0x6b6   :  { %1104 = vadd.xlane.f32.xlu0 %v1103_v21 }
 0x6b7   :  { %1483 = vmatmul.mubr.msk.bf16.vlgmr.msra.gmra.mxu1 %vm311_vm2, %v1109_v22 }
 0x6b8   :  { %v1531_v23 = vpop.eup %1530  ;;  %1496 = vmatprep.mubr.msk.bf16.mxu1 %vm1707_vm0, %v1706_v0 }
 0x6b9   :  { %v1106_v25 = vsel %vm311_vm2, %v1531_v23, 0.0  ;;  %v1110_v27 = vpack.c.bf16 %v1531_v23, %v1531_v23 }
 0x6ba   :  { %417 = vadd.xlane.f32.xlu0 %v416_v24  ;;  %1107 = vadd.xlane.f32.xlu1 %v1106_v25 }
 0x6bb   :  { %1489 = vmatmul.mubr.msk.bf16.vlgmr.msra.gmra.mxu0 %vm311_vm2, %v1110_v27 }
 0x6be   :  { %420 = vadd.xlane.f32.xlu1 %v419_v28 }
 0x6d7   :  { %v641_v30 = vpop.xlane.xlu1 %640 }
 0x6d8   :  { %1532 = vrcp.f32 %v641_v30 }
 0x6db   :  { %v877_v31 = vpop.xlane.xlu1 %876  ;;  %v644_v35 = vpop.xlane.xlu0 %643 }
 0x6dc   :  { %1534 = vrcp.f32 %v877_v31 }
 0x6dd   :  { %1536 = vrcp.f32 %v644_v35 }
 0x6df   :  { %v874_v32 = vpop.xlane.xlu0 %873 }
 0x6e0   :  { %1538 = vrcp.f32 %v874_v32 }
 0x6e5   :  { %v1533_v16 = vpop.eup %1532 }
 0x6e6   :  { %v747_v47 = vmul.f32 %v1533_v16, %v1958_v5 }
 0x6e8   :  { %751 = vrot.lane.b32.xlu0 %v747_v47, %s1701_s23 }
 0x6e9   :  { %v1535_v33 = vpop.eup %1534 }
 0x6ea   :  { %v1537_v44 = vpop.eup %1536  ;;  %v979_v49 = vmul.f32 %v1535_v33, %v1998_v50  ;;  %v1228_v50 = vld [vmem:[#allocation12 + $0x18] sm:$0xff] }
 0x6eb   :  { %v748_v19 = vmul.f32 %v1537_v44, %v1960_v8 }
 0x6ec   :  { %984 = vrot.lane.b32.xlu0 %v979_v49, %s1711_s15 }
 0x6ed   :  { %v1539_v34 = vpop.eup %1538  ;;  %753 = vrot.lane.b32.xlu1 %v748_v19, %s1701_s23 }
 0x6ee   :  { %v978_v36 = vmul.f32 %v1539_v34, %v1996_v45 }
 0x6f1   :  { %982 = vrot.lane.b32.xlu1 %v978_v36, %s1711_s15 }
 0x73f   :  { %v1105_v37 = vpop.xlane.xlu0 %1104 }
 0x743   :  { %v1108_v38 = vpop.xlane.xlu1 %1107  ;;  %v418_v39 = vpop.xlane.xlu0 %417 }
 0x744   :  { %1540 = vrcp.f32 %v418_v39 }
 0x747   :  { %v421_v5 = vpop.xlane.xlu1 %420 }
 0x748   :  { %1542 = vrcp.f32 %v421_v5 }
 0x749   :  { %1544 = vrcp.f32 %v1105_v37 }
 0x74a   :  { %1546 = vrcp.f32 %v1108_v38 }
 0x751   :  { %v1541_v40 = vpop.eup %1540 }
 0x752   :  { %v519_v41 = vmul.f32 %v1541_v40, %v1916_v26  ;;  %v1227_v26 = vld [vmem:[#allocation12 + $0x10] sm:$0xff] }
 0x753   :  { %v1230_v52 = vpack.c.bf16 %v1228_v50, %v1227_v26 }
 0x754   :  { %521 = vst.msk [vmem:[#allocation2] sm:$0xff] %vm311_vm2, %v519_v41 }
 0x755   :  { %v1543_v42 = vpop.eup %1542  ;;  %1493 = vmatpush3.bf16.msra.mxu1 %v1230_v52 }
 0x756   :  { %v520_v8 = vmul.f32 %v1543_v42, %v1918_v29  ;;  %v1229_v29 = vpack.c.bf16 %v1226_v53, %v1225_v51  ;;  %1494 = vmatprep.subr.bf16.mxu1 %v1706_v0  ;;  %v1545_v55 = vpop.eup %1544 }
 0x757   :  { %v1547_v61 = vpop.eup %1546 }
 0x758   :  { %522 = vst.msk [vmem:[#allocation2 + $0x8] sm:$0xff] %vm311_vm2, %v520_v8 }
 0x759   :  { %1495 = vmatpush3.bf16.msra.mxu1 %v1229_v29 }
 0x75a   :  { %v752_v43 = vpop.permute.xlu0 %751 }
 0x75b   :  { %758 = vst.msk [vmem:[#allocation2] sm:$0xff] %vm757_vm4, %v752_v43 }
 0x75e   :  { %v985_v45 = vpop.permute.xlu0 %984 }
 0x75f   :  { %v754_v46 = vpop.permute.xlu1 %753 }
 0x760   :  { %759 = vst.msk [vmem:[#allocation2 + $0x8] sm:$0xff] %vm757_vm4, %v754_v46 }
 0x761   :  { %990 = vst.msk [vmem:[#allocation2 + $0x8] sm:$0xff] %vm988_vm5, %v985_v45 }
 0x763   :  { %v983_v48 = vpop.permute.xlu1 %982 }
 0x764   :  { %989 = vst.msk [vmem:[#allocation2] sm:$0xff] %vm988_vm5, %v983_v48 }
 0x777   :  { %v1153_v56 = vpop.f32.mrf.mxu1 }
 0x778   :  { %v1209_v57 = vmul.f32 %v1545_v55, %v1153_v56 }
 0x779   :  { %v1484_v60 = vpop.f32.mrf.mxu1 }
 0x77a   :  { %1213 = vrot.lane.b32.xlu1 %v1209_v57, %s1712_s5 }
 0x77b   :  { %v1156_v62 = vpop.f32.mrf.mxu1  ;;  %v1201_v1 = vpop.f32.mrf.mxu0 }
 0x77c   :  { %v1210_v2 = vmul.f32 %v1547_v61, %v1201_v1 }
 0x77d   :  { %v1485_v3 = vpop.f32.mrf.mxu1  ;;  %v1490_v4 = vpop.f32.mrf.mxu0 }
 0x77e   :  { %1215 = vrot.lane.b32.xlu0 %v1210_v2, %s1712_s5 }
 0x77f   :  { %v1204_v6 = vpop.f32.mrf.mxu0 }
 0x781   :  { %v1491_v7 = vpop.f32.mrf.mxu0 }
 0x7ec   :  { %v1214_v9 = vpop.permute.xlu1 %1213 }
 0x7ed   :  { %1220 = vst.msk [vmem:[#allocation2] sm:$0xff] %vm1219_vm6, %v1214_v9 }
 0x7f0   :  { %v1216_v0 = vpop.permute.xlu0 %1215 }
 0x7f1   :  { %1221 = vst.msk [vmem:[#allocation2 + $0x8] sm:$0xff] %vm1219_vm6, %v1216_v0 }
 0x7f4   :  { %v1222_v10 = vld [vmem:[#allocation2] sm:$0xff] }
 0x7f8   :  { %v1223_v11 = vld [vmem:[#allocation2 + $0x8] sm:$0xff] }
 0x7f9   :  { %v1224_v12 = vpack.c.bf16 %v1223_v11, %v1222_v10 }
 0x7fb   :  { %1497 = vmatmul.mubr.msk.bf16.vlgmr.msra.gmra.mxu1 %vm142_vm1, %v1224_v12 }
 0x8bb   :  { %v1275_v58 = vpop.f32.mrf.mxu1 }
 0x8bc   :  { %v1276_v14 = vadd.f32 %v1326_v13, %v1275_v58 }
 0x8bd   :  { %v1498_v15 = vpop.f32.mrf.mxu1 }
 0x8be   :  { %1282 = vst.msk [vmem:[#allocation14] sm:$0xff] %vm142_vm1, %v1276_v14 }
 0x8bf   :  { %v1278_v54 = vpop.f32.mrf.mxu1 }
 0x8c0   :  { %v1279_v59 = vadd.f32 %v1326_v13, %v1278_v54 }
 0x8c1   :  { %v1499_v17 = vpop.f32.mrf.mxu1 }
 0x8c2   :  { %1283 = vst.msk [vmem:[#allocation14 + $0x8] sm:$0xff] %vm142_vm1, %v1279_v59 }
 0x8c3   :  { %1679 = shalt.err (!%p1676_p6)
}
 0x8c4   :  { %1295 = dma.vmem_to_hbm [thread:$0]  %s1290_s19, 256, %s2059_s11, [#allocation5], %s1700_s22, %s1700_s22, %s1701_s23  }
 0x8c5   :  { %1696 = dma.done.wait [#allocation5], 256  }
 0x8c6   :  { %1697 = vsyncadd [#allocation5], 4294967040 }
 0x8c7   :  { %1299 = vsyncpa [#allocation4], 1 }
 0x8c8   :  { %1300 = vsyncpa [#allocation7], 1 }
 0x8c9   :  { %1301 = vsyncpa [#allocation10], 1 }
 0x8ca   :  { %1302 = vsyncpa [#allocation13], 1 }
 0x8cb   :  { %1303 = vsyncpa [#allocation5], 1 }

</bundles_post_ra>
